<compile_context>
chip_gen: v6e
topology: v6e:2x2x1
jax: 0.10.0
libtpu: 0.0.40
codegen_flags: <defaults>
</compile_context>

<pallas_src>
import jax
import jax.numpy as jnp
from jax.experimental import pallas as pl
from jax.experimental.pallas import tpu as pltpu

HIDDEN = 128
_W2_PAD_ROWS = 8  # pad W2^T up to a full sublane tile so layer 2 is tile-aligned


def _round_up(x, m):
    return ((x + m - 1) // m) * m


def _discriminator_kernel(x_ref, w1_ref, b1_ref, w2t_ref, b2_ref, o_ref):
    """One batch tile.

    x_ref  : (TM, D)   f32/bf16 VMEM   batch tile
    w1_ref : (D, 128)  f32/bf16 VMEM   resident (constant index_map)
    b1_ref : (1, 128)  f32      VMEM   resident
    w2t_ref: (8, 128)  f32      VMEM   row 0 = W2^T, rows 1..7 zero, resident
    b2_ref : (1,)      f32      SMEM   scalar bias
    o_ref  : (1, TM)   f32      VMEM   lane-dense output tile
    """
    # Layer 1 on the MXU with f32 accumulation; bias + ReLU on the VPU.
    h = jnp.dot(x_ref[...], w1_ref[...], preferred_element_type=jnp.float32)
    h = jnp.maximum(h + b1_ref[...], 0.0)                       # (TM, 128)

    # Layer 2 as an NT contraction: (8,128) x (TM,128)^T -> (8, TM).
    # Row 0 holds the real logits; the result is lane-dense (last dim = TM),
    # avoiding the 1-of-128-lane masked stores a (TM, 1) column would cause.
    z8 = jax.lax.dot_general(
        w2t_ref[...], h,
        dimension_numbers=(((1,), (1,)), ((), ())),
        preferred_element_type=jnp.float32)
    z = z8[0:1, :] + b2_ref[0]                                  # (1, TM)
    o_ref[...] = jax.nn.sigmoid(z).astype(o_ref.dtype)


def discriminator_forward(x, w1, b1, w2, b2, *, block_rows=512,
                          use_bf16_matmul=False):
    """x: [B, input_dim] -> [B, 1] float32.

    Math: sigmoid(relu(x @ W1 + b1) @ W2 + b2), identical to the PyTorch module
    (weights stored [in, out]).
    """
    assert block_rows % 128 == 0, "block_rows must be a multiple of 128"
    x = jnp.asarray(x)
    B, D = x.shape

    # Batch tile: large enough to pipeline DMA/compute, small enough to fit the
    # default scoped VMEM on every chip generation (incl. 64 MiB v7x).
    tm = min(block_rows, _round_up(B, 8))
    b_pad = _round_up(B, tm)
    if b_pad != B:
        x = jnp.pad(x, ((0, b_pad - B), (0, 0)))   # tail rows sliced off below

    # Optional bf16 operands for layer 1 (halves HBM traffic for x; f32 accum).
    mm_dtype = jnp.bfloat16 if use_bf16_matmul else jnp.float32
    x_mm = x.astype(mm_dtype)
    w1_mm = jnp.asarray(w1).astype(mm_dtype)

    b1_row = jnp.asarray(b1, jnp.float32).reshape(1, HIDDEN)
    w2t = jnp.zeros((_W2_PAD_ROWS, HIDDEN), jnp.float32).at[0].set(
        jnp.asarray(w2, jnp.float32).reshape(HIDDEN))
    b2_s = jnp.asarray(b2, jnp.float32).reshape(1)

    grid = (b_pad // tm,)
    out = pl.pallas_call(
        _discriminator_kernel,
        out_shape=jax.ShapeDtypeStruct((1, b_pad), jnp.float32),
        grid=grid,
        in_specs=[
            pl.BlockSpec((tm, D), lambda i: (i, 0)),                  # x: batch-tiled
            pl.BlockSpec((D, HIDDEN), lambda i: (0, 0)),              # W1: resident
            pl.BlockSpec((1, HIDDEN), lambda i: (0, 0)),              # b1: resident
            pl.BlockSpec((_W2_PAD_ROWS, HIDDEN), lambda i: (0, 0)),   # W2^T: resident
            pl.BlockSpec(memory_space=pltpu.MemorySpace.SMEM),        # b2: SMEM scalar
        ],
        out_specs=pl.BlockSpec((1, tm), lambda i: (0, i)),            # lane-dense out
        compiler_params=pltpu.CompilerParams(
            dimension_semantics=("parallel",)),
    )(x_mm, w1_mm, b1_row, w2t, b2_s)

    # (1, B_pad) -> (B, 1): same element order; drop the padded tail rows.
    return out.reshape(b_pad, 1)[:B]


def init_params(key, input_dim):
    """Deterministic init mimicking nn.Linear's U(-1/sqrt(fan_in), 1/sqrt(fan_in))."""
    k1, k2, k3, k4 = jax.random.split(key, 4)
    lim1 = 1.0 / jnp.sqrt(jnp.float32(input_dim))
    lim2 = 1.0 / jnp.sqrt(jnp.float32(HIDDEN))
    w1 = jax.random.uniform(k1, (input_dim, HIDDEN), jnp.float32, -lim1, lim1)
    b1 = jax.random.uniform(k2, (1, HIDDEN), jnp.float32, -lim1, lim1)
    w2 = jax.random.uniform(k3, (HIDDEN, 1), jnp.float32, -lim2, lim2)
    b2 = jax.random.uniform(k4, (1,), jnp.float32, -lim2, lim2)
    return w1, b1, w2, b2


if __name__ == "__main__":
    key = jax.random.PRNGKey(0)
    k_x, k_p, k_x2 = jax.random.split(key, 3)

    input_dim = 16
    w1, b1, w2, b2 = init_params(k_p, input_dim)

    def ref_forward(xx):
        return jax.nn.sigmoid(jnp.maximum(xx @ w1 + b1, 0.0) @ w2 + b2)

    # 1) Small batch (single tile), f32 path.
    x_small = jax.random.normal(k_x, (8, input_dim), jnp.float32)
    out_small = jax.block_until_ready(discriminator_forward(x_small, w1, b1, w2, b2))
    assert out_small.shape == (8, 1)
    assert jnp.allclose(out_small, ref_forward(x_small), atol=2e-5, rtol=2e-5)

    # 2) Multi-tile batch with a ragged tail (grid of 3, padded to 384 rows).
    x_big = jax.random.normal(k_x2, (300, input_dim), jnp.float32)
    out_big = jax.block_until_ready(
        discriminator_forward(x_big, w1, b1, w2, b2, block_rows=128))
    assert out_big.shape == (300, 1)
    assert jnp.allclose(out_big, ref_forward(x_big), atol=1e-4, rtol=1e-4)

    # 3) bf16 layer-1 operands (halves HBM traffic for x on v6e/v7x), f32 accum.
    out_bf16 = jax.block_until_ready(
        discriminator_forward(x_big, w1, b1, w2, b2, block_rows=128,
                              use_bf16_matmul=True))
    assert out_bf16.shape == (300, 1)
    assert jnp.allclose(out_bf16, ref_forward(x_big), atol=3e-2, rtol=3e-2)

    print("KERNEL_OK")
</pallas_src>

<mosaic_0001>
module attributes {stable_mosaic.version = 11 : i64} {
  func.func @_discriminator_kernel(%arg0: i32, %arg1: memref<8x16xf32, #tpu.memory_space<vmem>>, %arg2: memref<16x128xf32, #tpu.memory_space<vmem>>, %arg3: memref<1x128xf32, #tpu.memory_space<vmem>>, %arg4: memref<8x128xf32, #tpu.memory_space<vmem>>, %arg5: memref<1xf32, #tpu.memory_space<smem>>, %arg6: memref<1x8xf32, #tpu.memory_space<vmem>>) attributes {dimension_semantics = [#tpu.dimension_semantics<parallel>], iteration_bounds = array<i64: 1>, scalar_prefetch = 0 : i64, scratch_operands = 0 : i64, tpu.core_type = #tpu.core_type<tc>, window_params = [{transform_indices = @transform_0, window_bounds = array<i64: 8, 16>}, {pipeline_mode = #tpu.pipeline_mode<synchronous>, transform_indices = @transform_1, window_bounds = array<i64: 16, 128>}, {pipeline_mode = #tpu.pipeline_mode<synchronous>, transform_indices = @transform_2, window_bounds = array<i64: 1, 128>}, {pipeline_mode = #tpu.pipeline_mode<synchronous>, transform_indices = @transform_3, window_bounds = array<i64: 8, 128>}, {transform_indices = @transform_4, window_bounds = array<i64: 1>}, {transform_indices = @transform_5, window_bounds = array<i64: 1, 8>}]} {
    %c0 = arith.constant 0 : index
    %c0_0 = arith.constant 0 : index
    %0 = vector.load %arg1[%c0, %c0_0] : memref<8x16xf32, #tpu.memory_space<vmem>>, vector<8x16xf32>
    %c0_1 = arith.constant 0 : index
    %c0_2 = arith.constant 0 : index
    %1 = vector.load %arg2[%c0_1, %c0_2] : memref<16x128xf32, #tpu.memory_space<vmem>>, vector<16x128xf32>
    %cst = arith.constant dense<0.000000e+00> : vector<8x128xf32>
    %2 = tpu.matmul %0, %1, %cst {dimension_numbers = #tpu.dot_dimension_numbers<[1], [0], [0], [1], [0, 0, 1, 1], [], []>} : vector<8x16xf32>, vector<16x128xf32>, vector<8x128xf32> -> vector<8x128xf32>
    %c0_3 = arith.constant 0 : index
    %c0_4 = arith.constant 0 : index
    %3 = vector.load %arg3[%c0_3, %c0_4] : memref<1x128xf32, #tpu.memory_space<vmem>>, vector<1x128xf32>
    %4 = vector.broadcast %3 : vector<1x128xf32> to vector<8x128xf32>
    %5 = arith.addf %2, %4 : vector<8x128xf32>
    %cst_5 = arith.constant 0.000000e+00 : f32
    %6 = vector.broadcast %cst_5 : f32 to vector<8x128xf32>
    %7 = arith.maximumf %5, %6 : vector<8x128xf32>
    %c0_6 = arith.constant 0 : index
    %c0_7 = arith.constant 0 : index
    %8 = vector.load %arg4[%c0_6, %c0_7] : memref<8x128xf32, #tpu.memory_space<vmem>>, vector<8x128xf32>
    %cst_8 = arith.constant dense<0.000000e+00> : vector<8x8xf32>
    %9 = tpu.matmul %8, %7, %cst_8 {dimension_numbers = #tpu.dot_dimension_numbers<[1], [1], [0], [0], [0, 0, 1, 0], [], []>} : vector<8x128xf32>, vector<8x128xf32>, vector<8x8xf32> -> vector<8x8xf32>
    %10 = vector.extract_strided_slice %9 {offsets = [0, 0], sizes = [1, 8], strides = [1, 1]} : vector<8x8xf32> to vector<1x8xf32>
    %c0_9 = arith.constant 0 : index
    %11 = memref.load %arg5[%c0_9] : memref<1xf32, #tpu.memory_space<smem>>
    %12 = vector.broadcast %11 : f32 to vector<1x8xf32>
    %13 = arith.addf %10, %12 : vector<1x8xf32>
    %14 = arith.negf %13 : vector<1x8xf32>
    %15 = math.exp %14 : vector<1x8xf32>
    %cst_10 = arith.constant 1.000000e+00 : f32
    %16 = vector.broadcast %cst_10 : f32 to vector<1x8xf32>
    %17 = arith.addf %16, %15 : vector<1x8xf32>
    %18 = arith.divf %16, %17 : vector<1x8xf32>
    %c0_11 = arith.constant 0 : index
    %c0_12 = arith.constant 0 : index
    %19 = vector.load %arg6[%c0_11, %c0_12] : memref<1x8xf32, #tpu.memory_space<vmem>>, vector<1x8xf32>
    tpu.vector_store %arg6[%c0_11, %c0_12], %18 {strides = array<i32>} : memref<1x8xf32, #tpu.memory_space<vmem>>, vector<1x8xf32>,
    return
  }
  func.func @transform_0(%arg0: i32) -> (i32, i32) {
    %c0_i32 = arith.constant 0 : i32
    %c0_i32_0 = arith.constant 0 : i32
    return %arg0, %c0_i32 : i32, i32
  }
  func.func @transform_1(%arg0: i32) -> (i32, i32) {
    %c0_i32 = arith.constant 0 : i32
    %c0_i32_0 = arith.constant 0 : i32
    %c0_i32_1 = arith.constant 0 : i32
    return %c0_i32, %c0_i32_0 : i32, i32
  }
  func.func @transform_2(%arg0: i32) -> (i32, i32) {
    %c0_i32 = arith.constant 0 : i32
    %c0_i32_0 = arith.constant 0 : i32
    %c0_i32_1 = arith.constant 0 : i32
    return %c0_i32, %c0_i32_0 : i32, i32
  }
  func.func @transform_3(%arg0: i32) -> (i32, i32) {
    %c0_i32 = arith.constant 0 : i32
    %c0_i32_0 = arith.constant 0 : i32
    %c0_i32_1 = arith.constant 0 : i32
    return %c0_i32, %c0_i32_0 : i32, i32
  }
  func.func @transform_4(%arg0: i32) -> i32 {
    %c0_i32 = arith.constant 0 : i32
    %c0_i32_0 = arith.constant 0 : i32
    return %c0_i32 : i32
  }
  func.func @transform_5(%arg0: i32) -> (i32, i32) {
    %c0_i32 = arith.constant 0 : i32
    %c0_i32_0 = arith.constant 0 : i32
    return %c0_i32, %arg0 : i32, i32
  }
}

</mosaic_0001>

<bundles_post_ra>
// kernel: tpu_custom_call.1
= control target key start
LH: loop header
LB: loop body
LE: loop exit
PB: predicated region body
PF: predicated region fallthrough
CT: control target
= control target key end

     0   :  { %11 = vsyncpa [#allocation4], 0  ;;  %s416_s0 = inlined_call_operand.hbm [shape: f32[8,16], index: 0, kind: input, shape index: {}]   ;;  %s417_s1 = inlined_call_operand.hbm [shape: f32[16,128], index: 1, kind: input, shape index: {}]   ;;  %s418_s2 = inlined_call_operand.vmem [shape: f32[1,128], index: 2, kind: input, shape index: {}]   ;;  %s419_s3 = inlined_call_operand.hbm [shape: f32[8,128], index: 3, kind: input, shape index: {}]   ;;  %s420_s4 = inlined_call_operand.<no memory space> [shape: f32[1], index: 4, kind: input, shape index: {}]   ;;  %s421_s5 = inlined_call_operand.hbm [shape: f32[1,8], index: 5, kind: output, shape index: {}]  }
   0x1   :  { %12 = vsyncpa [#allocation7], 0 }
   0x2   :  { %13 = vsyncpa [#allocation5], 0  ;;  %s360_s18 = smov [#allocation6]  }
   0x3   :  { %s29_s19 = sshll.u32 %s360_s18, 4  ;;  %s30_s19 = int_to_ptr.vmem [resolvable:$true] %s29_s19 }
   0x4   :  { %s282_s20 = scalar_lea.vmem %s30_s19, 256  ;;  %p287_p1 = scmp.lt.s32.totalorder %s30_s19, %s30_s19 }
   0x5   :  { %p283_p0 = scmp.ne.s32.totalorder %s30_s19, %s282_s20  ;;  %p288_p2 = scmp.lt.s32.totalorder %s282_s20, %s282_s20 }
   0x7   :  { %p289_p3 = por %p288_p2, %p287_p1 }
   0x9   :  { %p290_p4 = pnand %p289_p3, %p283_p0 }
   0xb   :  { %293 = shalt.err (!%p290_p4)
}
   0xc   :  { %s361_s21 = smov 128   ;;  %s362_s22 = smov 8  }
   0xd   :  { %35 = dma.hbm_to_vmem [thread:$0]  %s417_s1, 256, %s30_s19, [#allocation7], %s361_s21, %s361_s21, %s362_s22  }
   0xe   :  { %s363_s25 = smov [#allocation3]   ;;  %s364_s27 = smov [#allocation8]  }
   0xf   :  { %s20_s26 = sshll.u32 %s363_s25, 4  ;;  %s44_s28 = sshll.u32 %s364_s27, 4  ;;  %s21_s26 = int_to_ptr.vmem [resolvable:$true] %s20_s26  ;;  %s45_s28 = int_to_ptr.vmem [resolvable:$true] %s44_s28 }
  0x10   :  { %s302_s29 = scalar_lea.vmem %s21_s26, 128  ;;  %p307_p6 = scmp.lt.s32.totalorder %s21_s26, %s21_s26 }
  0x11   :  { %p303_p5 = scmp.ne.s32.totalorder %s21_s26, %s302_s29  ;;  %p308_p7 = scmp.lt.s32.totalorder %s302_s29, %s302_s29 }
  0x13   :  { %p309_p8 = por %p308_p7, %p307_p6 }
  0x15   :  { %p310_p9 = pnand %p309_p8, %p303_p5 }
  0x17   :  { %313 = shalt.err (!%p310_p9)
}
  0x18   :  { %23 = dma.hbm_to_vmem [thread:$0]  %s416_s0, 128, %s21_s26, [#allocation4]  }
  0x19   :  { %s322_s7 = scalar_lea.vmem %s45_s28, 128  ;;  %p327_p11 = scmp.lt.s32.totalorder %s45_s28, %s45_s28 }
  0x1a   :  { %p323_p10 = scmp.ne.s32.totalorder %s45_s28, %s322_s7  ;;  %p328_p12 = scmp.lt.s32.totalorder %s322_s7, %s322_s7 }
  0x1c   :  { %p329_p13 = por %p328_p12, %p327_p11 }
  0x1e   :  { %p330_p0 = pnand %p329_p13, %p323_p10 }
  0x20   :  { %333 = shalt.err (!%p330_p0)
}
  0x21   :  { %47 = dma.hbm_to_vmem [thread:$0]  %s419_s3, 128, %s45_s28, [#allocation7]  }
  0x22   :  { %354 = dma.done.wait [#allocation4], 128  }
  0x23   :  { %355 = vsyncadd [#allocation4], 4294967168 }
  0x24   :  { %356 = dma.done.wait [#allocation7], 384  }
  0x25   :  { %357 = vsyncadd [#allocation7], 4294966912  ;;  %v365_v0 = vmov 0.0   ;;  %vm366_vm0 = vmmov 0   ;;  %v61_v1 = vld [vmem:[#allocation6 + $0x8] sm:$0xff]  ;;  %v60_v2 = vld [vmem:[#allocation6] sm:$0xff]  ;;  %v216_v10 = vstv %s420_s4 }
  0x26   :  { %250 = vmatprep.subr.mxu0 %v365_v0  ;;  %254 = vmatprep.mubr.msk.f32.mxu0 %vm366_vm0, %v365_v0  ;;  %v59_v3 = vld [vmem:[#allocation3] sm:$0xff]  ;;  %vm69_vm1 = vcmask 130048   ;;  %v144_v9 = vld [vmem:[#allocation8] sm:$0xff]  ;;  %vm224_vm2 = vcmask 57344  }
  0x27   :  { %257 = vmatprep.subr.mxu1 %v365_v0  ;;  %259 = vmatprep.mubr.msk.f32.mxu1 %vm366_vm0, %v365_v0  ;;  %v242_v4 = vld [vmem:[%s418_s2] ss:$0 sm:$0xff]  ;;  %s367_s2 = smov [#allocation9]  }
  0x28   :  { %251 = vmatpush3.msra.mxu0 %v61_v1  ;;  %s232_s11 = sshll.u32 %s367_s2, 4  ;;  %s233_s11 = int_to_ptr.vmem [resolvable:$true] %s232_s11 }
  0x29   :  { %252 = vmatprep.subr.mxu0 %v365_v0  ;;  %s334_s12 = scalar_lea.vmem %s233_s11, 16  ;;  %s338_s13 = scalar_lea.vmem %s233_s11, 32 }
  0x2a   :  { %253 = vmatpush3.msra.mxu0 %v60_v2  ;;  %p335_p1 = scmp.ne.s32.totalorder %s233_s11, %s334_s12  ;;  %p339_p2 = scmp.lt.s32.totalorder %s233_s11, %s233_s11 }
  0x2b   :  { %255 = vmatmul.mubr.msk.f32.vlgmr.msra.gmra.mxu0 %vm69_vm1, %v59_v3  ;;  %p340_p3 = scmp.lt.s32.totalorder %s338_s13, %s334_s12 }
  0x2d   :  { %p341_p4 = por %p340_p3, %p339_p2 }
  0x2f   :  { %p342_p5 = pnand %p341_p4, %p335_p1 }
  0xeb   :  { %v139_v5 = vpop.f32.mrf.mxu0 }
  0xec   :  { %v140_v6 = vadd.f32 %v242_v4, %v139_v5 }
  0xed   :  { %v256_v7 = vpop.f32.mrf.mxu0 }
  0xee   :  { %v143_v8 = vmax.f32 %v140_v6, 0.0 }
  0xf0   :  { %258 = vmatpush3.xpose.msra.mxu1 %v143_v8 }
  0xf3   :  { %260 = vmatmul.mubr.f32.vlgmr.msra.gmra.mxu1 %v144_v9 }
 0x1b3   :  { %v211_v11 = vpop.f32.mrf.mxu1 }
 0x1b4   :  { %v217_v12 = vadd.f32 %v216_v10, %v211_v11 }
 0x1b5   :  { %v261_v13 = vpop.f32.mrf.mxu1 }
 0x1b6   :  { %v244_v14 = vmul.f32 -1.442695, %v217_v12 }
 0x1b8   :  { %270 = vpow2.f32 %v244_v14 }
 0x1c5   :  { %v271_v15 = vpop.eup %270 }
 0x1c6   :  { %v221_v16 = vadd.f32 1.0, %v271_v15 }
 0x1c8   :  { %272 = vrcp.f32 %v221_v16 }
 0x1d5   :  { %v273_v17 = vpop.eup %272 }
 0x1d6   :  { %225 = vst.msk [vmem:[#allocation9] sm:$0x1] %vm224_vm2, %v273_v17 }
 0x1d7   :  { %345 = shalt.err (!%p342_p5)
}
 0x1d8   :  { %235 = dma.vmem_to_hbm [thread:$0]  %s233_s11, 16, %s421_s5, [#allocation5]  }
 0x1d9   :  { %358 = dma.done.wait [#allocation5], 16  }
 0x1da   :  { %359 = vsyncadd [#allocation5], 4294967280 }
 0x1db   :  { %239 = vsyncpa [#allocation4], 1 }
 0x1dc   :  { %240 = vsyncpa [#allocation7], 1 }
 0x1dd   :  { %241 = vsyncpa [#allocation5], 1 }

</bundles_post_ra>
